<compile_context>
chip_gen: v6e
topology: v6e:2x2x1
jax: 0.10.0
libtpu: 0.0.40
codegen_flags: <defaults>
</compile_context>

<pallas_src>
import jax
import jax.numpy as jnp
from jax.experimental import pallas as pl
from jax.experimental.pallas import tpu as pltpu


def _make_attention_kernel(B, L, De, Dd, A, matmul_dtype):
    def kernel(dec_ref, enc_ref, params_ref, out_ref):
        # dec_ref    : (B, Dd)        decoder hidden (f32)
        # enc_ref    : (L*B, De)      encoder outputs, seq-major flat (f32)
        # params_ref : (Dd+De+1, A)   packed [W_dec.T ; W_enc.T ; bias] (f32)
        # out_ref    : (B, L)         softmax attention weights (f32)

        # Static, sublane-aligned views into the single packed parameter slab
        # (free; one DMA instead of three).  The f32->bf16 cast (if any)
        # happens here, after the DMA, so HBM traffic stays 4 B/elem.
        wd = params_ref[:Dd, :].astype(matmul_dtype)             # (Dd, A)
        we = params_ref[Dd:Dd + De, :].astype(matmul_dtype)      # (De, A)
        b = params_ref[Dd + De:Dd + De + 1, :]                   # (1, A)  f32

        dec = dec_ref[...].astype(matmul_dtype)                  # (B, Dd)
        enc = enc_ref[...].astype(matmul_dtype)                  # (L*B, De)

        # Decoder projection with the bias folded in ONCE (the decoder term is
        # identical for every source position -> L-fold fewer bias adds).
        dec_b = jnp.dot(dec, wd, preferred_element_type=jnp.float32) + b   # (B, A)

        # Encoder projection: one clean MXU matmul on the flat seq-major slab.
        enc_proj = jnp.dot(enc, we, preferred_element_type=jnp.float32)    # (L*B, A)

        # Stay 2-D: tile the (B, A) decoder term so row l*B+b lines up with the
        # seq-major encoder rows (avoids the (L, B, A) sub-8-sublane relayout).
        energy = jnp.tanh(enc_proj + jnp.tile(dec_b, (L, 1)))              # (L*B, A)

        # attn_dim reduction.  A = 32 -> a lane reduce is fine; for large A use
        # an MXU ones-matmul (dot(energy, ones((A, 1)))) instead.
        scores = jnp.sum(energy, axis=-1)                                  # (L*B,)

        # Tiny reorder to the module's (B, L) output layout.
        scores = scores.reshape(L, B).T                                    # (B, L)

        # Numerically stable softmax over src_len.  Exact divide so every row
        # sums to 1 (the approx EUP reciprocal was pure error at this size).
        m = jnp.max(scores, axis=-1, keepdims=True)
        e = jnp.exp(scores - m)
        denom = jnp.sum(e, axis=-1, keepdims=True)
        out_ref[...] = e / denom

    return kernel


def prepare_attention_params(weight, bias):
    """One-time packing of the nn.Linear params into a single f32 slab
    [W.T ; bias] of shape (attn_in + 1, attn_dim).

    Call this ONCE outside the per-step hot path (the slab is reused every
    decode step), so the per-call wrapper does zero weight transposes / slices
    / casts and the kernel sees a single parameter DMA.
    """
    A = weight.shape[0]
    w_t = jnp.transpose(weight).astype(jnp.float32)                  # (attn_in, A)
    return jnp.concatenate([w_t, bias.reshape(1, A).astype(jnp.float32)], axis=0)


def attention_forward(decoder_hidden, encoder_outputs, packed_params,
                      *, matmul_dtype=jnp.float32):
    """decoder_hidden: [B, Dd], encoder_outputs: [L, B, De] (seq-major),
    packed_params: [Dd+De+1, A] from prepare_attention_params().
    Returns softmax attention weights [B, L].

    matmul_dtype=jnp.bfloat16 halves MXU operand width on ALL TPU generations
    (v5e's MXU natively consumes bf16 too); the cast happens inside the kernel
    after the DMA, and accumulation / tanh / softmax stay f32.
    """
    L, B, De = encoder_outputs.shape
    Dd = decoder_hidden.shape[1]
    A = packed_params.shape[1]
    assert packed_params.shape[0] == Dd + De + 1

    # Consume the seq-major (L, B, De) tensor directly: the flatten to
    # (L*B, De) is a contiguous no-op reshape, NOT an HBM transpose.
    enc_flat = encoder_outputs.reshape(L * B, De)

    kernel = _make_attention_kernel(B, L, De, Dd, A, matmul_dtype)

    # Single invocation, no grid: at these toy sizes pipeline prologue /
    # epilogue and double-buffered VMEM would be pure overhead.
    # TODO(synk): at production sizes, tile src_len/batch with a "parallel"
    # grid axis (2 TensorCores on v7x), size blocks against v7x's 32 MiB scoped
    # / 64 MiB physical VMEM, make the output L-tile a multiple of 128 for
    # unmasked stores, and target 256-wide MXU tiles on v6e/v7x.
    return pl.pallas_call(
        kernel,
        out_shape=jax.ShapeDtypeStruct((B, L), jnp.float32),
        in_specs=[
            pl.BlockSpec(memory_space=pltpu.MemorySpace.VMEM),
            pl.BlockSpec(memory_space=pltpu.MemorySpace.VMEM),
            pl.BlockSpec(memory_space=pltpu.MemorySpace.VMEM),
        ],
        out_specs=pl.BlockSpec(memory_space=pltpu.MemorySpace.VMEM),
    )(decoder_hidden, enc_flat, packed_params)


def attention_reference(decoder_hidden, encoder_outputs, weight, bias):
    """Pure-JAX mirror of the PyTorch forward, for verification."""
    L = encoder_outputs.shape[0]
    rep_dec = jnp.repeat(decoder_hidden[:, None, :], L, axis=1)          # (B, L, Dd)
    enc = jnp.transpose(encoder_outputs, (1, 0, 2))                      # (B, L, De)
    x = jnp.concatenate([rep_dec, enc], axis=2)                          # (B, L, Dd+De)
    energy = jnp.tanh(jnp.einsum("bli,ai->bla", x, weight) + bias)
    attention = jnp.sum(energy, axis=2)
    return jax.nn.softmax(attention, axis=1)


if __name__ == "__main__":
    # Small shapes consistent with the module.
    enc_hid_dim = 16
    dec_hid_dim = 32
    attn_dim = 32
    src_len = 8
    batch = 2

    attn_in = enc_hid_dim * 2 + dec_hid_dim                              # 64

    key = jax.random.PRNGKey(0)
    k1, k2, k3, k4 = jax.random.split(key, 4)

    decoder_hidden = jax.random.normal(k1, (batch, dec_hid_dim), jnp.float32)
    encoder_outputs = jax.random.normal(
        k2, (src_len, batch, 2 * enc_hid_dim), jnp.float32)

    # Deterministic nn.Linear-like params: weight [attn_dim, attn_in], bias [attn_dim].
    bound = 1.0 / (attn_in ** 0.5)
    weight = jax.random.uniform(k3, (attn_dim, attn_in), jnp.float32, -bound, bound)
    bias = jax.random.uniform(k4, (attn_dim,), jnp.float32, -bound, bound)

    ref = attention_reference(decoder_hidden, encoder_outputs, weight, bias)

    # One-time parameter packing (outside the hot path, reused every call).
    packed_params = jax.block_until_ready(prepare_attention_params(weight, bias))

    # f32 matmul path.
    out = attention_forward(decoder_hidden, encoder_outputs, packed_params)
    out = jax.block_until_ready(out)
    assert out.shape == (batch, src_len)
    assert jnp.allclose(out, ref, atol=1e-4, rtol=1e-4), "f32 mismatch vs reference"
    assert jnp.allclose(jnp.sum(out, axis=1), 1.0, atol=1e-4), "rows must sum to 1"

    # bf16 MXU path (beneficial on v5e / v6e / v7x alike); softmax stays f32.
    out_bf16 = attention_forward(decoder_hidden, encoder_outputs, packed_params,
                                 matmul_dtype=jnp.bfloat16)
    out_bf16 = jax.block_until_ready(out_bf16)
    assert jnp.allclose(out_bf16, ref, atol=2e-2, rtol=2e-2), "bf16 mismatch vs reference"
    assert jnp.allclose(jnp.sum(out_bf16, axis=1), 1.0, atol=1e-3)

    print("KERNEL_OK")
</pallas_src>

<mosaic_0001>
module attributes {stable_mosaic.version = 11 : i64} {
  func.func @kernel(%arg0: memref<2x32xf32, #tpu.memory_space<vmem>>, %arg1: memref<16x32xf32, #tpu.memory_space<vmem>>, %arg2: memref<65x32xf32, #tpu.memory_space<vmem>>, %arg3: memref<2x8xf32, #tpu.memory_space<vmem>>) attributes {dimension_semantics = [], scalar_prefetch = 0 : i64, scratch_operands = 0 : i64, tpu.core_type = #tpu.core_type<tc>} {
    %c0 = arith.constant 0 : index
    %c0_0 = arith.constant 0 : index
    %0 = vector.load %arg2[%c0, %c0_0] : memref<65x32xf32, #tpu.memory_space<vmem>>, vector<32x32xf32>
    %c32 = arith.constant 32 : index
    %c0_1 = arith.constant 0 : index
    %1 = vector.load %arg2[%c32, %c0_1] : memref<65x32xf32, #tpu.memory_space<vmem>>, vector<32x32xf32>
    %c64 = arith.constant 64 : index
    %c0_2 = arith.constant 0 : index
    %2 = vector.load %arg2[%c64, %c0_2] : memref<65x32xf32, #tpu.memory_space<vmem>>, vector<1x32xf32>
    %c0_3 = arith.constant 0 : index
    %c0_4 = arith.constant 0 : index
    %3 = vector.load %arg0[%c0_3, %c0_4] : memref<2x32xf32, #tpu.memory_space<vmem>>, vector<2x32xf32>
    %c0_5 = arith.constant 0 : index
    %c0_6 = arith.constant 0 : index
    %4 = vector.load %arg1[%c0_5, %c0_6] : memref<16x32xf32, #tpu.memory_space<vmem>>, vector<16x32xf32>
    %cst = arith.constant dense<0.000000e+00> : vector<2x32xf32>
    %5 = tpu.matmul %3, %0, %cst {dimension_numbers = #tpu.dot_dimension_numbers<[1], [0], [0], [1], [0, 0, 1, 1], [], []>} : vector<2x32xf32>, vector<32x32xf32>, vector<2x32xf32> -> vector<2x32xf32>
    %6 = vector.broadcast %2 : vector<1x32xf32> to vector<2x32xf32>
    %7 = arith.addf %5, %6 : vector<2x32xf32>
    %cst_7 = arith.constant dense<0.000000e+00> : vector<16x32xf32>
    %8 = tpu.matmul %4, %1, %cst_7 {dimension_numbers = #tpu.dot_dimension_numbers<[1], [0], [0], [1], [0, 0, 1, 1], [], []>} : vector<16x32xf32>, vector<32x32xf32>, vector<16x32xf32> -> vector<16x32xf32>
    %9 = tpu.concatenate %7, %7, %7, %7, %7, %7, %7, %7 in 0 : vector<2x32xf32>, vector<2x32xf32>, vector<2x32xf32>, vector<2x32xf32>, vector<2x32xf32>, vector<2x32xf32>, vector<2x32xf32>, vector<2x32xf32> -> vector<16x32xf32>
    %10 = arith.addf %8, %9 : vector<16x32xf32>
    %11 = math.tanh %10 : vector<16x32xf32>
    %cst_8 = arith.constant dense<0.000000e+00> : vector<16xf32>
    %12 = vector.multi_reduction <add>, %11, %cst_8 [1] : vector<16x32xf32> to vector<16xf32>
    %13 = vector.shape_cast %12 : vector<16xf32> to vector<8x2xf32>
    %14 = tpu.transpose %13, [1, 0] : vector<8x2xf32> -> vector<2x8xf32>
    %cst_9 = arith.constant dense<0xFF800000> : vector<2xf32>
    %15 = vector.multi_reduction <maximumf>, %14, %cst_9 [1] : vector<2x8xf32> to vector<2xf32>
    %16 = vector.shape_cast %15 : vector<2xf32> to vector<2x1xf32>
    %17 = vector.broadcast %16 : vector<2x1xf32> to vector<2x8xf32>
    %18 = arith.subf %14, %17 : vector<2x8xf32>
    %19 = math.exp %18 : vector<2x8xf32>
    %cst_10 = arith.constant dense<0.000000e+00> : vector<2xf32>
    %20 = vector.multi_reduction <add>, %19, %cst_10 [1] : vector<2x8xf32> to vector<2xf32>
    %21 = vector.shape_cast %20 : vector<2xf32> to vector<2x1xf32>
    %22 = vector.broadcast %21 : vector<2x1xf32> to vector<2x8xf32>
    %23 = arith.divf %19, %22 : vector<2x8xf32>
    %c0_11 = arith.constant 0 : index
    %c0_12 = arith.constant 0 : index
    %24 = vector.load %arg3[%c0_11, %c0_12] : memref<2x8xf32, #tpu.memory_space<vmem>>, vector<2x8xf32>
    tpu.vector_store %arg3[%c0_11, %c0_12], %23 {strides = array<i32>} : memref<2x8xf32, #tpu.memory_space<vmem>>, vector<2x8xf32>,
    return
  }
}

</mosaic_0001>

<bundles_post_ra>
// kernel: tpu_custom_call.1
= control target key start
LH: loop header
LB: loop body
LE: loop exit
PB: predicated region body
PF: predicated region fallthrough
CT: control target
= control target key end

     0   :  { %v531_v2 = vmov 0.0   ;;  %s607_s0 = inlined_call_operand.vmem [shape: f32[2,32], index: 0, kind: input, shape index: {}]   ;;  %s608_s1 = inlined_call_operand.vmem [shape: f32[16,32], index: 1, kind: input, shape index: {}]   ;;  %s609_s2 = inlined_call_operand.vmem [shape: f32[65,32], index: 2, kind: input, shape index: {}]   ;;  %s610_s3 = inlined_call_operand.hbm [shape: f32[2,8], index: 3, kind: output, shape index: {}]  }
   0x1   :  { %v18_v0 = vld [vmem:[%s609_s2 + $0x18] sm:$0xff]  ;;  %468 = vmatprep.subr.mxu0 %v531_v2  ;;  %v17_v3 = vld [vmem:[%s609_s2 + $0x10] sm:$0xff]  ;;  %v16_v5 = vld [vmem:[%s609_s2 + $0x8] sm:$0xff] }
   0x2   :  { %v22_v1 = vld [vmem:[%s609_s2 + $0x38] sm:$0xff]  ;;  %v21_v4 = vld [vmem:[%s609_s2 + $0x30] sm:$0xff]  ;;  %469 = vmatpush3.msra.mxu0 %v18_v0  ;;  %v20_v6 = vld [vmem:[%s609_s2 + $0x28] sm:$0xff] }
   0x3   :  { %479 = vmatprep.subr.mxu1 %v22_v1  ;;  %470 = vmatprep.subr.mxu0 %v531_v2 }
   0x4   :  { %480 = vmatpush3.msra.mxu1 %v22_v1  ;;  %471 = vmatpush3.msra.mxu0 %v17_v3 }
   0x5   :  { %481 = vmatprep.subr.mxu1 %v21_v4 }
   0x6   :  { %482 = vmatpush3.msra.mxu1 %v21_v4 }
   0x7   :  { %8 = vsyncpa [#allocation3], 0  ;;  %472 = vmatprep.subr.mxu0 %v531_v2  ;;  %v15_v7 = vld [vmem:[%s609_s2] sm:$0xff]  ;;  %vm532_vm0 = vmmov 0   ;;  %483 = vmatprep.subr.mxu1 %v20_v6  ;;  %vm31_vm1 = vcmask 261120   ;;  %v26_v11 = vld [vmem:[%s608_s1 + $0x8] sm:$0xff]  ;;  %v212_v31 = vlaneseq }
   0x8   :  { %476 = vmatprep.mubr.msk.f32.mxu0 %vm532_vm0, %v531_v2  ;;  %v19_v8 = vld [vmem:[%s609_s2 + $0x20] sm:$0xff]  ;;  %473 = vmatpush3.msra.mxu0 %v16_v5  ;;  %vm112_vm2 = vcmask 1041408   ;;  %vm114_vm3 = vcmask 1043456   ;;  %vm116_vm4 = vcmask 1045504   ;;  %v533_v30 = vmov 0  }
   0x9   :  { %v24_v9 = vld [vmem:[%s607_s0] sm:$0x3]  ;;  %474 = vmatprep.subr.mxu0 %v531_v2  ;;  %484 = vmatpush3.msra.mxu1 %v20_v6  ;;  %v534_v32 = vmov 1414812756   ;;  %v535_v34 = vmov 269488144  }
   0xa   :  { %v25_v10 = vld [vmem:[%s608_s1] sm:$0xff]  ;;  %475 = vmatpush3.msra.mxu0 %v15_v7  ;;  %485 = vmatprep.subr.mxu1 %v19_v8  ;;  %v224_v33 = vunpack.c.l.s4 %v534_v32  ;;  %v210_v35 = vunpack.c.l.s4 %v535_v34  ;;  %v536_v36 = vmov 842150450   ;;  %v537_v38 = vmov 1983009808   ;;  %s539_s1 = smov [#allocation2]  }
   0xb   :  { %477 = vmatmul.mubr.msk.f32.vlgmr.msra.gmra.mxu0 %vm31_vm1, %v24_v9  ;;  %486 = vmatpush3.msra.mxu1 %v19_v8  ;;  %v453_v12 = vld [vmem:[%s609_s2 + $0x40] ss:$0 sm:$0xff]  ;;  %v217_v37 = vunpack.c.l.s4 %v536_v36  ;;  %v266_v39 = vunpack.c.l.s4 %v537_v38  ;;  %v213_v40 = vshrl.u32 %v212_v31, 7  ;;  %v538_v44 = vmov 1987475062   ;;  %s445_s2 = sshll.u32 %s539_s1, 4  ;;  %s446_s2 = int_to_ptr.vmem [resolvable:$true] %s445_s2 }
   0xc   :  { %487 = vmatprep.mubr.msk.f32.mxu1 %vm31_vm1, %v25_v10  ;;  %500 = vset.pattern.permute.xlu0 %v533_v30  ;;  %v225_v41 = vunpack.c.0.s8 %v224_v33  ;;  %v211_v42 = vunpack.c.0.s8 %v210_v35  ;;  %v231_v45 = vunpack.c.l.s4 %v538_v44  ;;  %v346_v10 = vand.u32 127, %v212_v31  ;;  %s509_s8 = scalar_lea.vmem %s446_s2, 32  ;;  %p514_p1 = scmp.lt.s32.totalorder %s446_s2, %s446_s2 }
   0xd   :  { %488 = vmatmul.mubr.msk.f32.vlgmr.msra.gmra.mxu1 %vm31_vm1, %v26_v11  ;;  %499 = vset.pattern.permute.xlu1 %v533_v30  ;;  %v218_v43 = vunpack.c.0.s8 %v217_v37  ;;  %v267_v46 = vunpack.c.0.s8 %v266_v39  ;;  %vm379_vm5 = vcmask 1041409   ;;  %vm381_vm6 = vcmask 1042434   ;;  %p510_p0 = scmp.ne.s32.totalorder %s446_s2, %s509_s8  ;;  %p515_p2 = scmp.lt.s32.totalorder %s509_s8, %s509_s8 }
   0xe   :  { %v228_v47 = vsub.s32 %v225_v41, %v213_v40  ;;  %v214_v48 = vsub.s32 %v211_v42, %v213_v40  ;;  %v232_v50 = vunpack.c.0.s8 %v231_v45  ;;  %vm383_vm7 = vcmask 1043459  }
   0xf   :  { %v221_v49 = vsub.s32 %v218_v43, %v213_v40  ;;  %v270_v51 = vsub.s32 %v267_v46, %v213_v40  ;;  %vm385_vm8 = vcmask 1044484   ;;  %vm387_vm9 = vcmask 1045509   ;;  %p516_p3 = por %p515_p2, %p514_p1 }
  0x10   :  { %v235_v55 = vsub.s32 %v232_v50, %v213_v40  ;;  %vm389_vm10 = vcmask 1046534   ;;  %vm391_vm11 = vcmask 1047559   ;;  %vm426_vm12 = vcmask 58368  }
  0x11   :  { %p517_p4 = pnand %p516_p3, %p510_p0 }
  0xcb   :  { %v101_v13 = vpop.f32.mrf.mxu0 }
  0xcc   :  { %v102_v14 = vadd.f32 %v453_v12, %v101_v13  ;;  %v349_v12 = vsub.s32 %v346_v10, %v213_v40 }
  0xcd   :  { %v478_v15 = vpop.f32.mrf.mxu0  ;;  %v489_v18 = vpop.f32.mrf.mxu1 }
  0xce   :  { %v106_v16 = vrot.slane %v102_v14, 6  ;;  %v108_v17 = vrot.slane %v102_v14, 4  ;;  %v110_v19 = vrot.slane %v102_v14, 2 }
  0xcf   :  { %v190_v23 = vpop.f32.mrf.mxu1 }
  0xd0   :  { %v113_v20 = vsel %vm112_vm2, %v102_v14, %v106_v16 }
  0xd1   :  { %v115_v21 = vsel %vm114_vm3, %v113_v20, %v108_v17 }
  0xd2   :  { %v117_v22 = vsel %vm116_vm4, %v115_v21, %v110_v19 }
  0xd3   :  { %v191_v24 = vadd.f32 %v190_v23, %v117_v22  ;;  %v196_v25 = vadd.f32 %v489_v18, %v117_v22 }
  0xd5   :  { %501 = vtanh.f32 %v191_v24 }
  0xd6   :  { %503 = vtanh.f32 %v196_v25 }
  0xe2   :  { %v502_v26 = vpop.eup %501 }
  0xe3   :  { %v201_v27 = vsel %vm31_vm1, %v502_v26, 0.0  ;;  %v504_v28 = vpop.eup %503 }
  0xe4   :  { %202 = vadd.xlane.f32.xlu0 %v201_v27  ;;  %v204_v29 = vsel %vm31_vm1, %v504_v28, 0.0 }
  0xe8   :  { %205 = vadd.xlane.f32.xlu0 %v204_v29 }
 0x16d   :  { %v203_v52 = vpop.xlane.xlu0 %202 }
 0x16e   :  { %v229_v53 = vrot.slane %v203_v52, %v228_v47  ;;  %v215_v54 = vrot.slane %v203_v52, %v214_v48  ;;  %v222_v56 = vrot.slane %v203_v52, %v221_v49  ;;  %v236_v59 = vrot.slane %v203_v52, %v235_v55 }
 0x170   :  { %v285_v57 = vrot.slane %v229_v53, %v270_v51  ;;  %v271_v58 = vrot.slane %v215_v54, %v270_v51  ;;  %v278_v60 = vrot.slane %v222_v56, %v270_v51  ;;  %v292_v62 = vrot.slane %v236_v59, %v270_v51 }
 0x171   :  { %v206_v61 = vpop.xlane.xlu0 %205 }
 0x172   :  { %328 = vperm.xlu0 %500, %v285_v57   ;;  %322 = vperm.xlu1 %499, %v271_v58   ;;  %v243_v63 = vrot.slane %v206_v61, %v214_v48  ;;  %v250_v0 = vrot.slane %v206_v61, %v221_v49  ;;  %v257_v2 = vrot.slane %v206_v61, %v228_v47 }
 0x173   :  { %v264_v4 = vrot.slane %v206_v61, %v235_v55 }
 0x174   :  { %v299_v1 = vrot.slane %v243_v63, %v270_v51  ;;  %v306_v3 = vrot.slane %v250_v0, %v270_v51  ;;  %v313_v5 = vrot.slane %v257_v2, %v270_v51 }
 0x175   :  { %v320_v6 = vrot.slane %v264_v4, %v270_v51 }
 0x176   :  { %325 = vperm.xlu1 %499, %v278_v60  }
 0x17a   :  { %331 = vperm.xlu1 %499, %v292_v62  }
 0x17e   :  { %334 = vperm.xlu1 %499, %v299_v1  }
 0x182   :  { %337 = vperm.xlu1 %499, %v306_v3  }
 0x186   :  { %340 = vperm.xlu1 %499, %v313_v5  }
 0x18a   :  { %343 = vperm.xlu1 %499, %v320_v6  }
 0x1ed   :  { %v323_v7 = vpop.permute.xlu1 %322  ;;  %v329_v16 = vpop.permute.xlu0 %328 }
 0x1ee   :  { %v350_v15 = vrot.slane %v323_v7, %v349_v12  ;;  %v358_v19 = vrot.slane %v329_v16, %v349_v12 }
 0x1f1   :  { %v326_v8 = vpop.permute.xlu1 %325 }
 0x1f2   :  { %v354_v13 = vrot.slane %v326_v8, %v349_v12 }
 0x1f4   :  { %v380_v17 = vsel %vm379_vm5, %v354_v13, %v350_v15 }
 0x1f5   :  { %v332_v9 = vpop.permute.xlu1 %331  ;;  %v382_v23 = vsel %vm381_vm6, %v358_v19, %v380_v17 }
 0x1f6   :  { %v362_v18 = vrot.slane %v332_v9, %v349_v12 }
 0x1f8   :  { %v384_v25 = vsel %vm383_vm7, %v362_v18, %v382_v23 }
 0x1f9   :  { %v335_v11 = vpop.permute.xlu1 %334 }
 0x1fa   :  { %v366_v20 = vrot.slane %v335_v11, %v349_v12 }
 0x1fc   :  { %v386_v26 = vsel %vm385_vm8, %v366_v20, %v384_v25 }
 0x1fd   :  { %v338_v14 = vpop.permute.xlu1 %337 }
 0x1fe   :  { %v370_v22 = vrot.slane %v338_v14, %v349_v12 }
 0x200   :  { %v388_v28 = vsel %vm387_vm9, %v370_v22, %v386_v26 }
 0x201   :  { %v341_v21 = vpop.permute.xlu1 %340 }
 0x202   :  { %v374_v24 = vrot.slane %v341_v21, %v349_v12 }
 0x204   :  { %v390_v30 = vsel %vm389_vm10, %v374_v24, %v388_v28 }
 0x205   :  { %v344_v27 = vpop.permute.xlu1 %343 }
 0x206   :  { %v378_v29 = vrot.slane %v344_v27, %v349_v12 }
 0x208   :  { %v392_v31 = vsel %vm391_vm11, %v378_v29, %v390_v30 }
 0x209   :  { %394 = vxpose.xlu1.b32.start.end [1/1] (short) (narrow) %v392_v31, 8 }
 0x285   :  { %v410_v32 = vpop.trf.xlu1 }
 0x286   :  { %v427_v33 = vsel %vm426_vm12, %v410_v32, -inf }
 0x287   :  { %428 = vmax.xlane.f32.xlu0 %v427_v33 }
 0x310   :  { %v429_v34 = vpop.xlane.xlu0 %428 }
 0x311   :  { %v430_v35 = vsub.f32 %v410_v32, %v429_v34 }
 0x313   :  { %v431_v36 = vmul.f32 1.442695, %v430_v35 }
 0x315   :  { %505 = vpow2.f32 %v431_v36 }
 0x322   :  { %v506_v37 = vpop.eup %505 }
 0x323   :  { %v433_v38 = vsel %vm426_vm12, %v506_v37, 0.0 }
 0x324   :  { %434 = vadd.xlane.f32.xlu1 %v433_v38 }
 0x3ad   :  { %v435_v39 = vpop.xlane.xlu1 %434 }
 0x3ae   :  { %507 = vrcp.f32 %v435_v39 }
 0x3bb   :  { %v508_v40 = vpop.eup %507 }
 0x3bc   :  { %v437_v41 = vmul.f32 %v508_v40, %v506_v37 }
 0x3be   :  { %438 = vst.msk [vmem:[#allocation2] sm:$0x3] %vm426_vm12, %v437_v41 }
 0x3bf   :  { %520 = shalt.err (!%p517_p4)
}
 0x3c0   :  { %448 = dma.vmem_to_hbm [thread:$0]  %s446_s2, 32, %s610_s3, [#allocation3]  }
 0x3c1   :  { %529 = dma.done.wait [#allocation3], 32  }
 0x3c2   :  { %530 = vsyncadd [#allocation3], 4294967264 }
 0x3c3   :  { %452 = vsyncpa [#allocation3], 1 }

</bundles_post_ra>
